<compile_context>
chip_gen: v7x
topology: tpu7x:2x2x1
jax: 0.10.0
libtpu: 0.0.40
codegen_flags: <defaults>
</compile_context>

<pallas_src>
import jax
import jax.numpy as jnp
from jax.experimental import pallas as pl
from jax.experimental.pallas import tpu as pltpu


def _circular_selector_kernel(pos_ref, locx_ref, locy_ref, o_ref):
    # pos_ref : (2, tile_s)      current batch's (x, y) coords for this tile
    # locx_ref: (C, 1)           class-center x coords
    # locy_ref: (C, 1)           class-center y coords
    # o_ref   : (C, tile_s)      scores for this (batch, spatial tile)
    px = pos_ref[0:1, :].astype(jnp.float32)          # (1, tile_s)
    py = pos_ref[1:2, :].astype(jnp.float32)          # (1, tile_s)

    norm = jnp.sqrt(px * px + py * py)                # (1, tile_s)
    inv = 1.0 / (1e-8 + norm)                         # exact (matches torch)
    pnx = px * inv
    pny = py * inv

    # Broadcast: (1, tile_s) against (C, 1) -> (C, tile_s)
    dx = pnx - locx_ref[...].astype(jnp.float32)
    dy = pny - locy_ref[...].astype(jnp.float32)
    dist = jnp.sqrt(dx * dx + dy * dy)                # (C, tile_s)

    o_ref[...] = (1.0 - dist).astype(o_ref.dtype)     # radius = 1


def circular_selector_pallas(positions: jax.Array, nclasses: int) -> jax.Array:
    """Pallas TPU implementation of CircularSelector.forward."""
    assert positions.ndim >= 2 and positions.shape[1] == 2, (
        "positions must be (B, 2, *spatial)")
    B = positions.shape[0]
    spatial = positions.shape[2:]
    S = 1
    for d in spatial:
        S *= d

    pos2 = positions.reshape(B, 2, S)                 # lane-dense spatial axis

    # Class centers on the unit circle (precomputed, tiny, kept fully in VMEM).
    ang = (2.0 * jnp.pi / nclasses) * jnp.arange(nclasses, dtype=jnp.float32)
    locx = jnp.cos(ang).reshape(nclasses, 1)
    locy = jnp.sin(ang).reshape(nclasses, 1)

    # Lane tile: full extent when small (always legal), else a large multiple
    # of 128 so every store is an unmasked full-lane vst.
    tile_s = S if S <= 2048 else 2048
    grid = (B, pl.cdiv(S, tile_s))

    out = pl.pallas_call(
        _circular_selector_kernel,
        out_shape=jax.ShapeDtypeStruct((B, nclasses, S), positions.dtype),
        grid=grid,
        in_specs=[
            pl.BlockSpec((pl.Squeezed(), 2, tile_s), lambda b, s: (b, 0, s)),
            pl.BlockSpec((nclasses, 1), lambda b, s: (0, 0)),
            pl.BlockSpec((nclasses, 1), lambda b, s: (0, 0)),
        ],
        out_specs=pl.BlockSpec(
            (pl.Squeezed(), nclasses, tile_s), lambda b, s: (b, 0, s)),
        compiler_params=pltpu.CompilerParams(
            dimension_semantics=("parallel", "parallel")),
    )(pos2, locx, locy)

    return out.reshape((B, nclasses) + spatial)


def _circular_selector_ref(positions: jax.Array, nclasses: int) -> jax.Array:
    """Pure-JAX reference mirroring the PyTorch module."""
    B = positions.shape[0]
    spatial = positions.shape[2:]
    p = positions.reshape(B, 2, -1).transpose(0, 2, 1)          # (B, S, 2)
    norm = jnp.linalg.norm(p, axis=2, keepdims=True)
    p = p / (1e-8 + norm)
    ang = (2.0 * jnp.pi / nclasses) * jnp.arange(nclasses, dtype=jnp.float32)
    loc = jnp.stack([jnp.cos(ang), jnp.sin(ang)], axis=1)       # (C, 2)
    diff = p[:, :, None, :] - loc[None, None, :, :]             # (B, S, C, 2)
    dists = jnp.sqrt(jnp.sum(diff * diff, axis=-1))             # (B, S, C)
    scores = 1.0 - dists
    return scores.transpose(0, 2, 1).reshape((B, nclasses) + spatial)


if __name__ == "__main__":
    key = jax.random.PRNGKey(0)
    # positions: (batch=2, coords=2, spatial=16x16); nclasses=4 -> out (2,4,16,16)
    nclasses = 4
    positions = jax.random.normal(key, (2, 2, 16, 16), dtype=jnp.float32)

    y = circular_selector_pallas(positions, nclasses)
    jax.block_until_ready(y)

    y_ref = _circular_selector_ref(positions, nclasses)

    assert y.shape == (2, nclasses, 16, 16), y.shape
    assert y.dtype == positions.dtype, (y.dtype, positions.dtype)
    assert bool(jnp.allclose(y, y_ref, rtol=1e-5, atol=1e-5)), (
        "CircularSelector output mismatch")

    print("KERNEL_OK")
</pallas_src>

<mosaic_0001>
module attributes {stable_mosaic.version = 11 : i64} {
  func.func @_circular_selector_kernel(%arg0: i32, %arg1: i32, %arg2: memref<1x2x256xf32, #tpu.memory_space<vmem>>, %arg3: memref<4x1xf32, #tpu.memory_space<vmem>>, %arg4: memref<4x1xf32, #tpu.memory_space<vmem>>, %arg5: memref<1x4x256xf32, #tpu.memory_space<vmem>>) attributes {dimension_semantics = [#tpu.dimension_semantics<parallel>, #tpu.dimension_semantics<parallel>], iteration_bounds = array<i64: 2, 1>, scalar_prefetch = 0 : i64, scratch_operands = 0 : i64, tpu.core_type = #tpu.core_type<tc>, window_params = [{transform_indices = @transform_0, window_bounds = array<i64: 1, 2, 256>}, {pipeline_mode = #tpu.pipeline_mode<synchronous>, transform_indices = @transform_1, window_bounds = array<i64: 4, 1>}, {pipeline_mode = #tpu.pipeline_mode<synchronous>, transform_indices = @transform_2, window_bounds = array<i64: 4, 1>}, {transform_indices = @transform_3, window_bounds = array<i64: 1, 4, 256>}]} {
    %c0 = arith.constant 0 : index
    %c0_0 = arith.constant 0 : index
    %c0_1 = arith.constant 0 : index
    %0 = vector.load %arg2[%c0, %c0_0, %c0_1] : memref<1x2x256xf32, #tpu.memory_space<vmem>>, vector<1x1x256xf32>
    %1 = vector.shape_cast %0 : vector<1x1x256xf32> to vector<1x256xf32>
    %c0_2 = arith.constant 0 : index
    %c1 = arith.constant 1 : index
    %c0_3 = arith.constant 0 : index
    %2 = vector.load %arg2[%c0_2, %c1, %c0_3] : memref<1x2x256xf32, #tpu.memory_space<vmem>>, vector<1x1x256xf32>
    %3 = vector.shape_cast %2 : vector<1x1x256xf32> to vector<1x256xf32>
    %4 = arith.mulf %1, %1 : vector<1x256xf32>
    %5 = arith.mulf %3, %3 : vector<1x256xf32>
    %6 = arith.addf %4, %5 : vector<1x256xf32>
    %7 = math.sqrt %6 : vector<1x256xf32>
    %cst = arith.constant 9.99999993E-9 : f32
    %8 = vector.broadcast %cst : f32 to vector<1x256xf32>
    %9 = arith.addf %8, %7 : vector<1x256xf32>
    %cst_4 = arith.constant 1.000000e+00 : f32
    %10 = vector.broadcast %cst_4 : f32 to vector<1x256xf32>
    %11 = arith.divf %10, %9 : vector<1x256xf32>
    %12 = arith.mulf %1, %11 : vector<1x256xf32>
    %13 = arith.mulf %3, %11 : vector<1x256xf32>
    %c0_5 = arith.constant 0 : index
    %c0_6 = arith.constant 0 : index
    %14 = vector.load %arg3[%c0_5, %c0_6] : memref<4x1xf32, #tpu.memory_space<vmem>>, vector<4x1xf32>
    %15 = vector.broadcast %12 : vector<1x256xf32> to vector<4x256xf32>
    %16 = vector.broadcast %14 : vector<4x1xf32> to vector<4x256xf32>
    %17 = arith.subf %15, %16 : vector<4x256xf32>
    %c0_7 = arith.constant 0 : index
    %c0_8 = arith.constant 0 : index
    %18 = vector.load %arg4[%c0_7, %c0_8] : memref<4x1xf32, #tpu.memory_space<vmem>>, vector<4x1xf32>
    %19 = vector.broadcast %13 : vector<1x256xf32> to vector<4x256xf32>
    %20 = vector.broadcast %18 : vector<4x1xf32> to vector<4x256xf32>
    %21 = arith.subf %19, %20 : vector<4x256xf32>
    %22 = arith.mulf %17, %17 : vector<4x256xf32>
    %23 = arith.mulf %21, %21 : vector<4x256xf32>
    %24 = arith.addf %22, %23 : vector<4x256xf32>
    %25 = math.sqrt %24 : vector<4x256xf32>
    %cst_9 = arith.constant 1.000000e+00 : f32
    %26 = vector.broadcast %cst_9 : f32 to vector<4x256xf32>
    %27 = arith.subf %26, %25 : vector<4x256xf32>
    %c0_10 = arith.constant 0 : index
    %c0_11 = arith.constant 0 : index
    %c0_12 = arith.constant 0 : index
    %28 = vector.load %arg5[%c0_10, %c0_11, %c0_12] : memref<1x4x256xf32, #tpu.memory_space<vmem>>, vector<1x4x256xf32>
    %29 = vector.shape_cast %28 : vector<1x4x256xf32> to vector<4x256xf32>
    %30 = vector.shape_cast %27 : vector<4x256xf32> to vector<1x4x256xf32>
    tpu.vector_store %arg5[%c0_10, %c0_11, %c0_12], %30 {strides = array<i32>} : memref<1x4x256xf32, #tpu.memory_space<vmem>>, vector<1x4x256xf32>,
    return
  }
  func.func @transform_0(%arg0: i32, %arg1: i32) -> (i32, i32, i32) {
    %c0_i32 = arith.constant 0 : i32
    %c0_i32_0 = arith.constant 0 : i32
    return %arg0, %c0_i32, %arg1 : i32, i32, i32
  }
  func.func @transform_1(%arg0: i32, %arg1: i32) -> (i32, i32) {
    %c0_i32 = arith.constant 0 : i32
    %c0_i32_0 = arith.constant 0 : i32
    %c0_i32_1 = arith.constant 0 : i32
    return %c0_i32, %c0_i32_0 : i32, i32
  }
  func.func @transform_2(%arg0: i32, %arg1: i32) -> (i32, i32) {
    %c0_i32 = arith.constant 0 : i32
    %c0_i32_0 = arith.constant 0 : i32
    %c0_i32_1 = arith.constant 0 : i32
    return %c0_i32, %c0_i32_0 : i32, i32
  }
  func.func @transform_3(%arg0: i32, %arg1: i32) -> (i32, i32, i32) {
    %c0_i32 = arith.constant 0 : i32
    %c0_i32_0 = arith.constant 0 : i32
    return %arg0, %c0_i32, %arg1 : i32, i32, i32
  }
}

</mosaic_0001>

<bundles_post_ra>
// kernel: tpu_custom_call.1
= control target key start
LH: loop header
LB: loop body
LE: loop exit
PB: predicated region body
PF: predicated region fallthrough
CT: control target
= control target key end

     0   :  { %8 = vsyncpa [#allocation3], 0  ;;  %s677_s0 = inlined_call_operand.vmem [shape: f32[2,2,256], index: 0, kind: input, shape index: {}]   ;;  %s678_s1 = inlined_call_operand.vmem [shape: f32[4,1], index: 1, kind: input, shape index: {}]   ;;  %s679_s2 = inlined_call_operand.vmem [shape: f32[4,1], index: 2, kind: input, shape index: {}]   ;;  %s680_s3 = inlined_call_operand.hbm [shape: f32[2,4,256], index: 3, kind: output, shape index: {}]  }
   0x1   :  { %10 = vsyncpa [#allocation3 + $0x1], 0  ;;  %s559_s12 = smov 0   ;;  %s561_s13 = smov 0  }
   0x2   :  { %s563_s14 = smov 0   ;;  %s565_s15 = smov 0  }
   0x3   :  { %s567_s16 = smov 0   ;;  %s569_s17 = smov 0  }
   0x4 LB: > { %s376_s18 = sadd.s32 4294967295, %s535_s17   ;;  %s377_s19 = sadd.s32 4294967294, %s535_s17   ;;  %s535_s17 = sphi %s569_s17, %s16_s17   ;;  %s531_s16 = sphi %s567_s16, %s687_s16   ;;  %s527_s15 = sphi %s565_s15, %s686_s15   ;;  %s523_s14 = sphi %s563_s14, %s685_s14   ;;  %s519_s13 = sphi %s561_s13, %s684_s13   ;;  %s515_s12 = sphi %s559_s12, %s683_s12  }
   0x5   : > { %s28_s20 = sadd.s32 1, %s531_s16  ;;  %s107_s21 = sadd.s32 1, %s523_s14 }
   0x6   : > { %p30_p0 = scmp.ge.s32.totalorder %s28_s20, 2  ;;  %p117_p1 = scmp.ne.s32.totalorder %s523_s14, %s519_s13 }
   0x7   : > { %p118_p2 = scmp.eq.s32.totalorder %s376_s18, 1  ;;  %p123_p3 = scmp.ne.s32.totalorder %s519_s13, %s515_s12 }
   0x8   : > { %s689_s20 = smov (%p30_p0, %s28_s20), 0  ;;  %p124_p5 = scmp.eq.s32.totalorder %s377_s19, 1 }
   0x9   : > { %p599_p4 = por %p118_p2, %p117_p1  ;;  %s102_s23 = ssub.s32 %s531_s16, %s689_s20 }
   0xa   : > { %p380_p6 = scmp.ge.s32.totalorder %s535_s17, 1  ;;  %p105_p7 = scmp.eq.s32.totalorder %s102_s23, 0 }
   0xb   : > { %p606_p8 = por %p124_p5, %p123_p3  ;;  %p161_p9 = scmp.lt.s32.totalorder %s535_s17, 3 }
   0xc   : > { %s612_s25 = scalar_select %p105_p7, %s523_s14, %s107_s21  }
   0xd   : > { %p162_p10 = pnand %p380_p6, %p161_p9 }
   0xe   : > { %v218_v0 = vld [vmem:[%s678_s1] sm:$0xf] (!%p162_p10)  ;;  %v537_v1 = vmov (!%p162_p10), 0   ;;  %p190_p11 = scmp.lt.s32.totalorder (!%p162_p10), %s527_s15, 1  ;;  %v220_v14 = vlaneseq (!%p162_p10)  ;;  %s186_s8 = sand.u32 (!%p162_p10), 1, %s519_s13  }
   0xf   : > { %165 = sbr.rel (%p162_p10) target bundleno = 188 (0xbc), region = 32  ;;  %448 = vset.pattern.permute.xlu0 (!%p162_p10), %v537_v1  ;;  %v237_v2 = vld [vmem:[%s679_s2] sm:$0xf] (!%p162_p10)  ;;  %s381_s9 = sshll.u32 (!%p162_p10), %s186_s8, 3 }
  0x10   : > { %232 = vperm.xlu0 (!%p162_p10), %448, %v218_v0   ;;  %v221_v15 = vshrl.u32 (!%p162_p10), %v220_v14, 7  ;;  %s391_s10 = sshll.u32 (!%p162_p10), %s527_s15, 7  ;;  %s188_s11 = scalar_lea.vmem (!%p162_p10), [#allocation2], %s381_s9 }
  0x11   : > { %s300_s18 = sshll.u32 (!%p162_p10), %s188_s11, 4  ;;  %s630_s23 = scalar_lea.hbm (!%p162_p10), %s680_s3, %s391_s10  ;;  %s632_s18 = int_to_ptr.vmem [resolvable:$true] %s300_s18 }
  0x12   : > { %v222_v17 = vsub.s32 (!%p162_p10), 0, %v221_v15  ;;  %v226_v18 = vsub.s32 (!%p162_p10), 1, %v221_v15  ;;  %s284_s26 = scalar_lea.sflag (!%p162_p10), [#allocation3], %s186_s8  ;;  %s457_s27 = scalar_lea.vmem (!%p162_p10), %s632_s18, 128 }
  0x13   : > { %p458_p12 = scmp.ne.s32.totalorder (!%p162_p10), %s632_s18, %s457_s27 }
  0x14   : > { %251 = vperm.xlu0 (!%p162_p10), %448, %v237_v2  }
  0x15   : > { %p459_p13 = pnand (!%p162_p10), %p458_p12, %p599_p4 }
  0x16   : > { %s191_s30 = scalar_select %p190_p11, %s527_s15, 1 }
  0x17   : > { %p460_p0 = pneg %p459_p13  ;;  %s538_s15 = smov [#allocation2]  }
  0x18   : > { %s390_s4 = sshll.u32 %s191_s30, 2  ;;  %s461_s28 = sshll.u32 %s538_s15, 4  ;;  %s462_s28 = int_to_ptr.vmem [resolvable:$false] %s461_s28 }
  0x19   : > { %s197_s7 = scalar_lea.vmem %s677_s0, %s390_s4  ;;  %s463_s29 = scalar_lea.vmem %s462_s28, 256 }
  0x1a   : > { %v200_v3 = vld [vmem:[%s197_s7] ss:$2 sm:$0x3]  ;;  %v384_v4 = vld [vmem:[%s197_s7 + $0x1] ss:$2 sm:$0x3]  ;;  %p464_p1 = scmp.lt.s32.totalorder %s632_s18, %s462_s28  ;;  %p465_p2 = scmp.lt.s32.totalorder %s463_s29, %s457_s27 }
  0x1b   : > { %v203_v5 = vmul.f32 %v200_v3, %v200_v3  ;;  %v204_v6 = vmul.f32 %v384_v4, %v384_v4 }
  0x1c   : > { %p466_p3 = por %p465_p2, %p464_p1 }
  0x1d   : > { %v205_v7 = vadd.f32 %v204_v6, %v203_v5 }
  0x1e   : > { %p467_p5 = pnand %p466_p3, %p460_p0 }
  0x1f   : > { %449 = vrsqrt.f32 %v205_v7  ;;  %vm208_vm0 = vcmp.eq.f32.partialorder %v205_v7, inf  ;;  %v211_v10 = vand.u32 2147483648, %v205_v7  ;;  %vm210_vm1 = vcmp.eq.f32.partialorder %v205_v7, 0.0 }
  0x29   : > { %v450_v8 = vpop.eup %449 }
  0x2a   : > { %v207_v9 = vmul.f32 %v450_v8, %v205_v7 }
  0x2c   : > { %v209_v11 = vsel %vm208_vm0, %v205_v7, %v207_v9 }
  0x2d   : > { %v212_v12 = vsel %vm210_vm1, %v211_v10, %v209_v11 }
  0x2e   : > { %v213_v13 = vadd.f32 1e-08, %v212_v12 }
  0x30   : > { %451 = vrcp.f32 %v213_v13 }
  0x3a   : > { %v452_v16 = vpop.eup %451 }
  0x3b   : > { %v216_v19 = vmul.f32 %v452_v16, %v200_v3  ;;  %v217_v20 = vmul.f32 %v452_v16, %v384_v4 }
  0x3d   : > { %v223_v21 = vrot.slane %v216_v19, %v222_v17  ;;  %v227_v22 = vrot.slane %v216_v19, %v226_v18  ;;  %v242_v24 = vrot.slane %v217_v20, %v222_v17  ;;  %v246_v25 = vrot.slane %v217_v20, %v226_v18 }
  0x8f   : > { %v233_v23 = vpop.permute.xlu0 %232 }
  0x90   : > { %v235_v26 = vsub.f32 %v223_v21, %v233_v23  ;;  %v236_v27 = vsub.f32 %v227_v22, %v233_v23 }
  0x92   : > { %v256_v31 = vmul.f32 %v235_v26, %v235_v26  ;;  %v257_v32 = vmul.f32 %v236_v27, %v236_v27 }
  0x93   : > { %v252_v28 = vpop.permute.xlu0 %251 }
  0x94   : > { %v254_v29 = vsub.f32 %v242_v24, %v252_v28  ;;  %v255_v30 = vsub.f32 %v246_v25, %v252_v28 }
  0x96   : > { %v258_v33 = vmul.f32 %v254_v29, %v254_v29  ;;  %v259_v34 = vmul.f32 %v255_v30, %v255_v30 }
  0x98   : > { %v260_v35 = vadd.f32 %v258_v33, %v256_v31  ;;  %v261_v36 = vadd.f32 %v259_v34, %v257_v32 }
  0x9a   : > { %453 = vrsqrt.f32 %v260_v35  ;;  %vm264_vm2 = vcmp.eq.f32.partialorder %v260_v35, inf  ;;  %v267_v40 = vand.u32 2147483648, %v260_v35  ;;  %vm266_vm3 = vcmp.eq.f32.partialorder %v260_v35, 0.0 }
  0x9b   : > { %455 = vrsqrt.f32 %v261_v36  ;;  %vm271_vm4 = vcmp.eq.f32.partialorder %v261_v36, inf  ;;  %v274_v43 = vand.u32 2147483648, %v261_v36  ;;  %vm273_vm5 = vcmp.eq.f32.partialorder %v261_v36, 0.0 }
  0xa4   : > { %v454_v37 = vpop.eup %453 }
  0xa5   : > { %v456_v38 = vpop.eup %455  ;;  %v263_v39 = vmul.f32 %v454_v37, %v260_v35 }
  0xa6   : > { %v270_v41 = vmul.f32 %v456_v38, %v261_v36 }
  0xa7   : > { %v265_v42 = vsel %vm264_vm2, %v260_v35, %v263_v39 }
  0xa8   : > { %v268_v44 = vsel %vm266_vm3, %v267_v40, %v265_v42  ;;  %v272_v45 = vsel %vm271_vm4, %v261_v36, %v270_v41 }
  0xa9   : > { %v275_v46 = vsel %vm273_vm5, %v274_v43, %v272_v45  ;;  %v276_v47 = vsub.f32 1.0, %v268_v44 }
  0xaa   : > { %v277_v48 = vsub.f32 1.0, %v275_v46 }
  0xac   : > { %v280_v49 = vcombine.low %v276_v47, %v277_v48 }
  0xae   : > { %282 = vst [vmem:[%s188_s11] sm:$0xff] %v280_v49 }
  0xaf   : > { %470 = shalt.err (!%p467_p5)
}
  0xb0   : > { %s471_s30 = scalar_lea.hbm %s630_s23, 128  ;;  %s475_s6 = scalar_lea.hbm %s680_s3, 256 }
  0xb1   : > { %p472_p6 = scmp.ne.s32.totalorder %s630_s23, %s471_s30  ;;  %p476_p10 = scmp.lt.u32.totalorder %s630_s23, %s680_s3 }
  0xb2   : > { %p477_p11 = scmp.lt.u32.totalorder %s475_s6, %s471_s30  ;;  %p479_p13 = scmp.lt.u32.totalorder %s471_s30, %s630_s23 }
  0xb3   : > { %p473_p7 = pnand %p472_p6, %p599_p4 }
  0xb4   : > { %p478_p12 = por %p477_p11, %p476_p10 }
  0xb5   : > { %p474_p9 = pneg %p473_p7 }
  0xb6   : > { %p480_p0 = por %p479_p13, %p478_p12 }
  0xb8   : > { %p481_p1 = pnand %p480_p0, %p474_p9 }
  0xba   : > { %484 = shalt.err (!%p481_p1)
}
  0xbb   : > { %392 = dma.vmem_to_hbm [thread:$0]  (%p599_p4), %s632_s18, 128, %s630_s23, %s284_s26  }
  0xbc PF: > { %p398_p2 = scmp.ge.s32.totalorder %s535_s17, 2  ;;  %s312_s9 = sand.u32 1, %s515_s12  }
  0xbd   : > { %s313_s10 = scalar_lea.sflag [#allocation3], %s312_s9 }
  0xbe   : > { %p395_p3 = pnand %p398_p2, %p606_p8 }
  0xc0   : > { %510 = dma.done.wait (!%p395_p3), %s313_s10, 128  }
  0xc1   : > { %512 = vsyncadd (!%p395_p3), %s313_s10, 4294967168  ;;  %s16_s17 = sadd.s32 1, %s535_s17   ;;  %s683_s12 = smov %s519_s13 }
  0xc2   : > { %p13_p5 = scmp.ge.s32.totalorder %s16_s17, 4   ;;  %s684_s13 = smov %s523_s14 }
  0xc3   : > { %s685_s14 = smov %s612_s25  ;;  %s686_s15 = smov %s531_s16 }
  0xc4   : > { %s687_s16 = smov %s689_s20  ;;  %15 = sbr.rel (!%p13_p5) target bundleno = 4 (0x4), region = 68 }
  0xcb   :  { %318 = vsyncpa [#allocation3], 1 }
  0xcc   :  { %320 = vsyncpa [#allocation3 + $0x1], 1 }

</bundles_post_ra>
